<compile_context>
chip_gen: v5e
topology: v5e:2x2
jax: 0.10.0
libtpu: 0.0.40
codegen_flags: <defaults>
</compile_context>

<pallas_src>
import functools
import math

import numpy as np
import jax
import jax.numpy as jnp
from jax import lax
from jax.experimental import pallas as pl
from jax.experimental.pallas import tpu as pltpu


def _round_up(x, m):
    return ((x + m - 1) // m) * m


_PARALLEL_1D = pltpu.CompilerParams(dimension_semantics=("parallel",))


# --------------------------------------------------------------------------
# Dense (bias + optional relu) kernel
# --------------------------------------------------------------------------

def _dense_kernel(x_ref, w_ref, b_ref, o_ref, *, activation):
    y = jnp.dot(x_ref[...], w_ref[...],
                preferred_element_type=jnp.float32) + b_ref[...]
    if activation == "relu":
        y = jnp.maximum(y, 0.0)
    o_ref[...] = y.astype(o_ref.dtype)


def dense_pallas(x, w, b, activation="none", out_dtype=jnp.float32,
                 compute_dtype=jnp.bfloat16, tm=256):
    """y = act(x @ w + b); row-tiled grid, no wrapper-side padding."""
    x = jnp.asarray(x)
    w = jnp.asarray(w)
    b = jnp.asarray(b)
    M, K = x.shape
    N = w.shape[1]
    tm_eff = M if M <= tm else tm          # full-dim block (<=tm) or 8-aligned tile
    grid = pl.cdiv(M, tm_eff)
    xb = x.astype(compute_dtype)           # no-op if already pre-cast
    wb = w.astype(compute_dtype)
    bb = b.astype(jnp.float32).reshape(1, N)
    return pl.pallas_call(
        functools.partial(_dense_kernel, activation=activation),
        out_shape=jax.ShapeDtypeStruct((M, N), out_dtype),
        grid=(grid,),
        in_specs=[
            pl.BlockSpec((tm_eff, K), lambda i: (i, 0)),
            pl.BlockSpec((K, N), lambda i: (0, 0)),
            pl.BlockSpec((1, N), lambda i: (0, 0)),
        ],
        out_specs=pl.BlockSpec((tm_eff, N), lambda i: (i, 0)),
        compiler_params=_PARALLEL_1D,
    )(xb, wb, bb)


# --------------------------------------------------------------------------
# Fully fused decoder layer: self-attn + cross-attn + FFN in one kernel
# --------------------------------------------------------------------------

def _decoder_layer_kernel(x_ref, mem_ref, xpad_ref, mpad_ref,
                          wqkv_ref, bqkv_ref, wo_ref, bo_ref,
                          wq2_ref, bq2_ref, wkv2_ref, bkv2_ref,
                          wo2_ref, bo2_ref, w1_ref, b1_ref, w2_ref, b2_ref,
                          o_ref, *, tb, s_q, s_kv, d_head):
    neg = jnp.float32(-1e9)
    x = x_ref[...]                         # (tb*s_q, D) bf16
    mem = mem_ref[...]                     # (tb*s_kv, D) bf16

    def softmax_rows(s):
        s = s - jnp.max(s, axis=-1, keepdims=True)
        p = jnp.exp(s)
        return p * pl.reciprocal(jnp.sum(p, axis=-1, keepdims=True), approx=True)

    # ---- causal self-attention (softmax scale pre-folded into wqkv q cols) ----
    qkv = jnp.dot(x, wqkv_ref[...], preferred_element_type=jnp.float32) + bqkv_ref[...]
    q = qkv[:, :d_head].reshape(tb, s_q, d_head)
    k = qkv[:, d_head:2 * d_head].reshape(tb, s_q, d_head)
    v = qkv[:, 2 * d_head:].reshape(tb, s_q, d_head)
    s = jnp.einsum('bqd,bkd->bqk', q.astype(jnp.bfloat16), k.astype(jnp.bfloat16),
                   preferred_element_type=jnp.float32)
    qi = lax.broadcasted_iota(jnp.int32, (s_q, s_q), 0)
    ki = lax.broadcasted_iota(jnp.int32, (s_q, s_q), 1)
    masked = (xpad_ref[...] > 0.5) | (ki > qi)[None]      # (tb,1,S)|(1,S,S)->(tb,S,S)
    p = softmax_rows(jnp.where(masked, neg, s))
    attn = jnp.einsum('bqk,bkd->bqd', p.astype(jnp.bfloat16), v.astype(jnp.bfloat16),
                      preferred_element_type=jnp.float32).reshape(tb * s_q, d_head)
    out = jnp.dot(attn.astype(jnp.bfloat16), wo_ref[...],
                  preferred_element_type=jnp.float32) + bo_ref[...]
    h = x.astype(jnp.float32) + out        # residual stream stays in VMEM (f32)

    # ---- cross-attention ----
    hb = h.astype(jnp.bfloat16)
    q2 = (jnp.dot(hb, wq2_ref[...], preferred_element_type=jnp.float32)
          + bq2_ref[...]).reshape(tb, s_q, d_head)
    kv2 = jnp.dot(mem, wkv2_ref[...], preferred_element_type=jnp.float32) + bkv2_ref[...]
    k2 = kv2[:, :d_head].reshape(tb, s_kv, d_head)
    v2 = kv2[:, d_head:].reshape(tb, s_kv, d_head)
    s2 = jnp.einsum('bqd,bkd->bqk', q2.astype(jnp.bfloat16), k2.astype(jnp.bfloat16),
                    preferred_element_type=jnp.float32)
    p2 = softmax_rows(jnp.where(mpad_ref[...] > 0.5, neg, s2))
    attn2 = jnp.einsum('bqk,bkd->bqd', p2.astype(jnp.bfloat16), v2.astype(jnp.bfloat16),
                       preferred_element_type=jnp.float32).reshape(tb * s_q, d_head)
    out2 = jnp.dot(attn2.astype(jnp.bfloat16), wo2_ref[...],
                   preferred_element_type=jnp.float32) + bo2_ref[...]
    h = h + out2

    # ---- FFN ----
    hb = h.astype(jnp.bfloat16)
    ff = jnp.maximum(jnp.dot(hb, w1_ref[...],
                             preferred_element_type=jnp.float32) + b1_ref[...], 0.0)
    ff = jnp.dot(ff.astype(jnp.bfloat16), w2_ref[...],
                 preferred_element_type=jnp.float32) + b2_ref[...]
    o_ref[...] = (h + ff).astype(o_ref.dtype)
    # TODO(synk): for long sequence lengths on v7x (64 MiB VMEM) add a
    # flash-style second grid axis over the key dim with m/l/acc scratch; at
    # these shapes the full (S,Sm) score tile trivially fits.


def decoder_layer_pallas(x, x_pad_mask, mem, mem_pad_mask, dec,
                         tb=8, out_dtype=jnp.bfloat16):
    """Fused decoder layer.  x:(B,S,D), mem:(B,Sm,D); S/Sm multiples of 8."""
    B, S, D = x.shape
    Sm = mem.shape[1]
    d_head = dec['wo'].shape[0]
    H = dec['w1'].shape[1]
    tb_eff = B if B <= tb else tb
    grid = pl.cdiv(B, tb_eff)
    x2 = x.reshape(B * S, D).astype(jnp.bfloat16)
    m2 = mem.reshape(B * Sm, D).astype(jnp.bfloat16)
    kpx = x_pad_mask.astype(jnp.float32).reshape(B, 1, S)
    kpm = mem_pad_mask.astype(jnp.float32).reshape(B, 1, Sm)
    kernel = functools.partial(_decoder_layer_kernel, tb=tb_eff, s_q=S,
                               s_kv=Sm, d_head=d_head)
    rep = lambda i: (0, 0)
    out = pl.pallas_call(
        kernel,
        out_shape=jax.ShapeDtypeStruct((B * S, D), out_dtype),
        grid=(grid,),
        in_specs=[
            pl.BlockSpec((tb_eff * S, D), lambda i: (i, 0)),
            pl.BlockSpec((tb_eff * Sm, D), lambda i: (i, 0)),
            pl.BlockSpec((tb_eff, 1, S), lambda i: (i, 0, 0)),
            pl.BlockSpec((tb_eff, 1, Sm), lambda i: (i, 0, 0)),
            pl.BlockSpec((D, 3 * d_head), rep),
            pl.BlockSpec((1, 3 * d_head), rep),
            pl.BlockSpec((d_head, D), rep),
            pl.BlockSpec((1, D), rep),
            pl.BlockSpec((D, d_head), rep),
            pl.BlockSpec((1, d_head), rep),
            pl.BlockSpec((D, 2 * d_head), rep),
            pl.BlockSpec((1, 2 * d_head), rep),
            pl.BlockSpec((d_head, D), rep),
            pl.BlockSpec((1, D), rep),
            pl.BlockSpec((D, H), rep),
            pl.BlockSpec((1, H), rep),
            pl.BlockSpec((H, D), rep),
            pl.BlockSpec((1, D), rep),
        ],
        out_specs=pl.BlockSpec((tb_eff * S, D), lambda i: (i, 0)),
        compiler_params=_PARALLEL_1D,
    )(x2, m2, kpx, kpm,
      dec['wqkv'], dec['bqkv'], dec['wo'], dec['bo'],
      dec['wq2'], dec['bq2'], dec['wkv2'], dec['bkv2'],
      dec['wo2'], dec['bo2'], dec['w1'], dec['b1'], dec['w2'], dec['b2'])
    return out.reshape(B, S, D)


# --------------------------------------------------------------------------
# Cosine-similarity kernels (torch CosineSimilarity(dim=-1, eps=1e-6))
# --------------------------------------------------------------------------

def _cossim_shared_kernel(x_ref, yt_ref, invy_ref, o_ref):
    dot = jnp.dot(x_ref[...], yt_ref[...], preferred_element_type=jnp.float32)
    x32 = x_ref[...].astype(jnp.float32)
    inv_x = lax.rsqrt(jnp.maximum(jnp.sum(x32 * x32, axis=-1, keepdims=True),
                                  jnp.float32(1e-12)))
    o_ref[...] = (dot * inv_x * invy_ref[...]).astype(o_ref.dtype)


def cosine_sim_shared_pallas(x, y, tm=256):
    """x[M,D] vs shared table y[N,D] -> [M,N]; table pre-transposed to (D,N)."""
    x = jnp.asarray(x)
    y = jnp.asarray(y)
    M, D = x.shape
    N = y.shape[0]
    tm_eff = M if M <= tm else tm
    grid = pl.cdiv(M, tm_eff)
    xb = x.astype(jnp.bfloat16)
    y32 = y.astype(jnp.float32)
    y_t = y32.T.astype(jnp.bfloat16)                       # one-time, outside kernel
    inv_y = lax.rsqrt(jnp.maximum(jnp.sum(y32 * y32, axis=-1),
                                  1e-12)).reshape(1, N).astype(jnp.float32)
    return pl.pallas_call(
        _cossim_shared_kernel,
        out_shape=jax.ShapeDtypeStruct((M, N), jnp.float32),
        grid=(grid,),
        in_specs=[
            pl.BlockSpec((tm_eff, D), lambda i: (i, 0)),
            pl.BlockSpec((D, N), lambda i: (0, 0)),
            pl.BlockSpec((1, N), lambda i: (0, 0)),
        ],
        out_specs=pl.BlockSpec((tm_eff, N), lambda i: (i, 0)),
        compiler_params=_PARALLEL_1D,
    )(xb, y_t, inv_y)


def _cossim_batched_kernel(x_ref, y_ref, o_ref):
    # TODO(synk): small shapes; a batched einsum contraction would move this
    # to the MXU but the f32 elementwise path keeps norms exact and is tiny.
    x = x_ref[...].astype(jnp.float32)            # (tb, D)
    y = y_ref[...].astype(jnp.float32)            # (tb, N, D)
    dot = jnp.sum(y * x[:, None, :], axis=-1)     # (tb, N)
    inv_x = lax.rsqrt(jnp.maximum(jnp.sum(x * x, axis=-1, keepdims=True),
                                  jnp.float32(1e-12)))
    inv_y = lax.rsqrt(jnp.maximum(jnp.sum(y * y, axis=-1), jnp.float32(1e-12)))
    o_ref[...] = (dot * inv_x * inv_y).astype(o_ref.dtype)


def cosine_sim_batched_pallas(x, y, tb=128):
    """x[B,D] vs per-row candidates y[B,N,D] -> [B,N]."""
    x = jnp.asarray(x)
    y = jnp.asarray(y)
    B, D = x.shape
    N = y.shape[1]
    tb_eff = B if B <= tb else tb
    grid = pl.cdiv(B, tb_eff)
    return pl.pallas_call(
        _cossim_batched_kernel,
        out_shape=jax.ShapeDtypeStruct((B, N), jnp.float32),
        grid=(grid,),
        in_specs=[
            pl.BlockSpec((tb_eff, D), lambda i: (i, 0)),
            pl.BlockSpec((tb_eff, N, D), lambda i: (i, 0, 0)),
        ],
        out_specs=pl.BlockSpec((tb_eff, N), lambda i: (i, 0)),
        compiler_params=_PARALLEL_1D,
    )(x, y)


# --------------------------------------------------------------------------
# Ragged-length glue (host-side; single vectorized gather per call)
# --------------------------------------------------------------------------

def recover_embeddings(recovery, embeddings, pad_multiple=1):
    """pad_sequence equivalent: [sum(L_i), D] -> ([B, S, D], pad mask[B,S])."""
    lengths = np.asarray(recovery).astype(np.int64)
    B = len(lengths)
    S = _round_up(int(lengths.max()), pad_multiple)
    offsets = np.concatenate([[0], np.cumsum(lengths)[:-1]])
    valid = np.arange(S)[None, :] < lengths[:, None]
    idx = offsets[:, None] + np.minimum(np.arange(S)[None, :],
                                        np.maximum(lengths[:, None] - 1, 0))
    idx = np.where(valid, idx, 0).reshape(-1)
    padded = jnp.take(embeddings, jnp.asarray(idx, jnp.int32), axis=0)
    padded = padded.reshape(B, S, -1)
    padded = padded * jnp.asarray(valid.reshape(B, S, 1), padded.dtype)
    mask = jnp.asarray(~valid)                     # True == padding
    return padded, mask


def pad_ids(recovery, ids, pad_multiple=1):
    lengths = np.asarray(recovery).astype(np.int64)
    ids = np.asarray(ids)
    S = _round_up(int(lengths.max()), pad_multiple)
    out = np.zeros((len(lengths), S), dtype=np.int32)
    off = 0
    for i, l in enumerate(lengths):
        l = int(l)
        out[i, :l] = ids[off:off + l]
        off += l
    return jnp.asarray(out)


def pick_useful(embeddings, lengths):
    lengths = np.asarray(lengths).astype(np.int64)
    B, S = embeddings.shape[:2]
    rows = np.concatenate([i * S + np.arange(int(l)) for i, l in enumerate(lengths)])
    flat = embeddings.reshape(B * S, -1)
    return jnp.take(flat, jnp.asarray(rows, jnp.int32), axis=0)


# --------------------------------------------------------------------------
# Stand-in submodules / parameters (pre-cast to kernel dtypes at setup)
# --------------------------------------------------------------------------

def make_params(key, d_img, d_model, num_time=24, max_pos=16):
    keys = jax.random.split(key, 32)
    scale = 0.1
    it = iter(range(32))

    def nrm(shape):
        return scale * jax.random.normal(keys[next(it)], shape, jnp.float32)

    bf = jnp.bfloat16
    inv_sqrt_d = 1.0 / math.sqrt(d_model)

    p = {
        'ee_w': nrm((d_img, d_model)).astype(bf), 'ee_b': jnp.zeros((d_model,)),
        # poi encoder sees raw integer (id, category) pairs -> keep f32 path
        'poi_w': nrm((2, d_model)), 'poi_b': jnp.zeros((d_model,)),
        'qrp_wg': nrm((d_model, d_model)).astype(bf), 'qrp_bg': jnp.zeros((d_model,)),
        'qrp_wp': nrm((d_model, d_model)).astype(bf), 'qrp_bp': jnp.zeros((d_model,)),
        'pos_table': nrm((max_pos, d_model)),
        'time_table': nrm((num_time, d_model)),
        'time_table2': nrm((num_time, d_model)),
    }
    # decoder weights: fused qkv (self-attn), fused kv (cross-attn),
    # softmax 1/sqrt(d) folded into the q projections, all pre-cast to bf16.
    wq, wk, wv = nrm((d_model, d_model)), nrm((d_model, d_model)), nrm((d_model, d_model))
    wk2, wv2 = nrm((d_model, d_model)), nrm((d_model, d_model))
    dec = {
        'wqkv': jnp.concatenate([wq * inv_sqrt_d, wk, wv], axis=1).astype(bf),
        'bqkv': jnp.zeros((1, 3 * d_model), jnp.float32),
        'wo': nrm((d_model, d_model)).astype(bf), 'bo': jnp.zeros((1, d_model)),
        'wq2': (nrm((d_model, d_model)) * inv_sqrt_d).astype(bf),
        'bq2': jnp.zeros((1, d_model)),
        'wkv2': jnp.concatenate([wk2, wv2], axis=1).astype(bf),
        'bkv2': jnp.zeros((1, 2 * d_model), jnp.float32),
        'wo2': nrm((d_model, d_model)).astype(bf), 'bo2': jnp.zeros((1, d_model)),
        'w1': nrm((d_model, 4 * d_model)).astype(bf), 'b1': jnp.zeros((1, 4 * d_model)),
        'w2': nrm((4 * d_model, d_model)).astype(bf), 'b2': jnp.zeros((1, d_model)),
    }
    p['dec'] = dec
    return p


def trans_decoder(dec, x, x_pad_mask, mem, mem_pad_mask):
    """Single decoder layer == one fused Pallas kernel."""
    return decoder_layer_pallas(x, x_pad_mask, mem, mem_pad_mask, dec)


def arcface_loss(output, class_emb, target, margin, mask=None, scale=16.0):
    # TODO(synk): original ArcFaceLoss class not provided in the reference
    # source; standard additive-angular-margin softmax used as stand-in.
    if class_emb.ndim == 2:
        cos = cosine_sim_shared_pallas(output, class_emb)
    else:
        cos = cosine_sim_batched_pallas(output, class_emb)
    theta = jnp.arccos(jnp.clip(cos, -1.0 + 1e-7, 1.0 - 1e-7))
    onehot = jax.nn.one_hot(jnp.asarray(target), cos.shape[1], dtype=jnp.float32)
    logits = scale * jnp.cos(theta + margin * onehot)
    if mask is not None:
        logits = jnp.where(mask, -1e9, logits)
    logp = jax.nn.log_softmax(logits, axis=-1)
    return -jnp.mean(jnp.sum(onehot * logp, axis=-1))


def pick_candidate_poi(tile_prob, b_target_tile, b_target_poi,
                       tile_poi_tensor, tile_k):
    # Top-k + "force target tile into last slot" on device; only the tiny
    # [T, k] int index array crosses to host for the ragged candidate gather.
    # TODO(synk): ragged gather produces dynamic shapes; no static-shape
    # Pallas equivalent, stays as host glue.
    tgt_tile = jnp.asarray(b_target_tile, jnp.int32)
    _, idx = lax.top_k(tile_prob, tile_k)                      # [T, k]
    hitted = jnp.sum(idx == tgt_tile[:, None], axis=1)
    last_col = idx[:, -1] * hitted + tgt_tile * (hitted == 0)
    idx = idx.at[:, -1].set(last_col)

    filtered = np.asarray(jax.device_get(idx)).astype(np.int64)
    tgt_poi = np.asarray(b_target_poi).astype(np.int64)
    tpt = np.asarray(tile_poi_tensor).astype(np.int64)

    batch_size = filtered.shape[0]
    candidate = tpt[filtered.reshape(-1)].reshape(batch_size, -1, 2)
    mask = candidate != -1
    candidate_pois = candidate[mask].reshape(-1, 2)
    poi_recovery = mask.all(axis=-1).sum(axis=1)
    target_mask = candidate[:, :, 0] == tgt_poi[:, 0][:, None]
    position = np.where(target_mask)[1]
    position_mask = np.arange(candidate.shape[1])[None, :] < position[:, None]
    target_poi_index = (mask.all(axis=-1) & position_mask).sum(axis=1)
    return candidate_pois, poi_recovery, target_poi_index, int(mask.sum())


# --------------------------------------------------------------------------
# RoseTea forward
# --------------------------------------------------------------------------

def rosetea_forward(p, imagery_embeddings, leaves_id, tile_poi_tensor, tile_k,
                    traj_recovery, b_leaves_seq, b_poi_traj, b_pos_seq,
                    b_time_stamp, history_traj_recovery, b_history_traj,
                    subgraph_recovery, b_subgraph_nodes, b_subgraph,
                    b_target_tile, b_target_poi, debug_nan_check=False):
    d_model = p['ee_w'].shape[1]
    bf = jnp.bfloat16

    # EE: tile node embeddings for all imagery tiles (bf16 out: consumers re-cast)
    TNE = dense_pallas(imagery_embeddings, p['ee_w'], p['ee_b'], out_dtype=bf)
    LE = TNE[jnp.asarray(leaves_id)]                               # leaves table

    # QRP graph model stand-in: adjacency aggregation + projections
    sub_nodes_emb = TNE[jnp.asarray(b_subgraph_nodes)]
    hist_poi_emb = dense_pallas(jnp.asarray(b_history_traj, jnp.float32),
                                p['poi_w'], p['poi_b'],
                                compute_dtype=jnp.float32, out_dtype=bf)
    agg = dense_pallas(jnp.asarray(b_subgraph, jnp.float32), sub_nodes_emb,
                       jnp.zeros((d_model,), jnp.float32), out_dtype=bf)
    subgraph_tile_embedding = dense_pallas(agg, p['qrp_wg'], p['qrp_bg'],
                                           activation="relu", out_dtype=bf)
    subgraph_poi_embedding = dense_pallas(hist_poi_emb, p['qrp_wp'], p['qrp_bp'],
                                          activation="relu", out_dtype=bf)

    # Decoder inputs padded to a multiple of 8 so in-kernel batched reshapes
    # are sublane-aligned; pad rows are masked as keys and dropped as queries.
    STE, STE_mask = recover_embeddings(subgraph_recovery, subgraph_tile_embedding, 8)
    SPE, SPE_mask = recover_embeddings(history_traj_recovery, subgraph_poi_embedding, 8)

    leaves_seq_embedding = TNE[jnp.asarray(b_leaves_seq)]
    LSE, LSE_mask = recover_embeddings(traj_recovery, leaves_seq_embedding, 8)
    poi_embedding = dense_pallas(jnp.asarray(b_poi_traj, jnp.float32),
                                 p['poi_w'], p['poi_b'], compute_dtype=jnp.float32)
    PE, PE_mask = recover_embeddings(traj_recovery, poi_embedding, 8)

    # pos_time_enc / time_enc stand-ins (table lookups, additive)
    pos_pad = pad_ids(traj_recovery, b_pos_seq, 8)
    time_pad = pad_ids(traj_recovery, b_time_stamp, 8)
    TE = LSE.astype(jnp.float32) + p['pos_table'][pos_pad] + p['time_table'][time_pad]
    PE = PE + p['time_table2'][time_pad]

    # Enqueue BOTH decoder passes + tile-side probability/loss before the
    # host-blocking candidate gather so the device keeps working during it.
    tile_output = trans_decoder(p['dec'], TE, LSE_mask, STE, STE_mask)
    tile_output = pick_useful(tile_output, traj_recovery)          # [T, D] bf16
    poi_output = trans_decoder(p['dec'], PE, PE_mask, SPE, SPE_mask)
    poi_output = pick_useful(poi_output, traj_recovery)            # [T, D] bf16

    tile_probability = cosine_sim_shared_pallas(tile_output, LE)   # [T, n_leaves]
    tile_loss = arcface_loss(tile_output, LE, b_target_tile, margin=0.05)

    candidate_pois, poi_recovery, target_poi_index, _num = pick_candidate_poi(
        tile_probability, b_target_tile, b_target_poi, tile_poi_tensor, tile_k)
    candidate_poi_embedding = dense_pallas(
        jnp.asarray(candidate_pois, jnp.float32), p['poi_w'], p['poi_b'],
        compute_dtype=jnp.float32)
    CPE, CPE_mask = recover_embeddings(poi_recovery, candidate_poi_embedding)

    poi_probability = cosine_sim_batched_pallas(poi_output, CPE)   # [T, C]
    poi_probability = jnp.where(CPE_mask, -1.0, poi_probability)
    poi_loss = arcface_loss(poi_output, CPE, target_poi_index, margin=0.1,
                            mask=CPE_mask)

    if debug_nan_check:
        # TODO(synk): host-sync NaN check; only valid outside jax.jit.
        if bool(jnp.isnan(tile_output.astype(jnp.float32)).any()) or \
           bool(jnp.isnan(tile_loss).any()):
            raise RuntimeError("WTF! NaN in tile_output / tile_loss")

    return (tile_probability, tile_loss, poi_probability, poi_loss,
            jnp.asarray(target_poi_index))


# --------------------------------------------------------------------------

if __name__ == "__main__":
    d_img, d_model = 64, 128          # lane-dense feature dim (multiple of 128)
    num_tiles, n_leaves = 16, 8
    tile_k, P = 2, 3

    keys = jax.random.split(jax.random.PRNGKey(0), 12)
    params = make_params(keys[0], d_img, d_model)

    imagery_embeddings = jax.random.normal(keys[1], (num_tiles, d_img), jnp.float32)
    leaves = np.arange(n_leaves, dtype=np.int32)

    # tile -> poi lookup table, (-1,-1) padded, unique poi ids per tile
    tpt = -np.ones((n_leaves, P, 2), dtype=np.int32)
    for t in range(n_leaves):
        nvalid = 3 if t % 2 == 0 else 2
        for j in range(nvalid):
            tpt[t, j, 0] = 100 + t * 10 + j
            tpt[t, j, 1] = (t + j) % 5

    traj_recovery = np.array([3, 4], dtype=np.int32); T = int(traj_recovery.sum())
    history_traj_recovery = np.array([2, 3], dtype=np.int32); H = int(history_traj_recovery.sum())
    subgraph_recovery = np.array([3, 2], dtype=np.int32); G = int(subgraph_recovery.sum())

    b_leaves_seq = np.asarray(jax.random.randint(keys[2], (T,), 0, num_tiles), np.int32)
    b_poi_traj = np.asarray(jax.random.randint(keys[3], (T, 2), 0, 50), np.int32)
    b_pos_seq = np.concatenate([np.arange(int(l)) for l in traj_recovery]).astype(np.int32)
    b_time_stamp = np.asarray(jax.random.randint(keys[4], (T,), 0, 24), np.int32)
    b_history_traj = np.asarray(jax.random.randint(keys[5], (H, 2), 0, 50), np.int32)
    b_subgraph_nodes = np.asarray(jax.random.randint(keys[6], (G,), 0, num_tiles), np.int32)
    adj = (np.asarray(jax.random.uniform(keys[7], (G, G))) > 0.5).astype(np.float32)
    b_subgraph = np.clip(adj + np.eye(G, dtype=np.float32), 0.0, 1.0)
    b_target_tile = np.asarray(jax.random.randint(keys[8], (T,), 0, n_leaves), np.int32)
    b_target_poi = tpt[b_target_tile, 0, :]    # first valid poi of each target tile

    outs = rosetea_forward(params, imagery_embeddings, leaves, tpt, tile_k,
                           traj_recovery, b_leaves_seq, b_poi_traj, b_pos_seq,
                           b_time_stamp, history_traj_recovery, b_history_traj,
                           subgraph_recovery, b_subgraph_nodes, b_subgraph,
                           b_target_tile, b_target_poi)
    jax.block_until_ready(outs)
    print("KERNEL_OK")
</pallas_src>

<mosaic_0001>
module attributes {stable_mosaic.version = 11 : i64} {
  func.func @_dense_kernel(%arg0: i32, %arg1: memref<16x64xbf16, #tpu.memory_space<vmem>>, %arg2: memref<64x128xbf16, #tpu.memory_space<vmem>>, %arg3: memref<1x128xf32, #tpu.memory_space<vmem>>, %arg4: memref<16x128xbf16, #tpu.memory_space<vmem>>) attributes {dimension_semantics = [#tpu.dimension_semantics<parallel>], iteration_bounds = array<i64: 1>, scalar_prefetch = 0 : i64, scratch_operands = 0 : i64, tpu.core_type = #tpu.core_type<tc>, window_params = [{transform_indices = @transform_0, window_bounds = array<i64: 16, 64>}, {pipeline_mode = #tpu.pipeline_mode<synchronous>, transform_indices = @transform_1, window_bounds = array<i64: 64, 128>}, {pipeline_mode = #tpu.pipeline_mode<synchronous>, transform_indices = @transform_2, window_bounds = array<i64: 1, 128>}, {transform_indices = @transform_3, window_bounds = array<i64: 16, 128>}]} {
    %c0 = arith.constant 0 : index
    %c0_0 = arith.constant 0 : index
    %0 = vector.load %arg1[%c0, %c0_0] : memref<16x64xbf16, #tpu.memory_space<vmem>>, vector<16x64xbf16>
    %c0_1 = arith.constant 0 : index
    %c0_2 = arith.constant 0 : index
    %1 = vector.load %arg2[%c0_1, %c0_2] : memref<64x128xbf16, #tpu.memory_space<vmem>>, vector<64x128xbf16>
    %cst = arith.constant dense<0.000000e+00> : vector<16x128xf32>
    %2 = tpu.matmul %0, %1, %cst {dimension_numbers = #tpu.dot_dimension_numbers<[1], [0], [0], [1], [0, 0, 1, 1], [], []>} : vector<16x64xbf16>, vector<64x128xbf16>, vector<16x128xf32> -> vector<16x128xf32>
    %c0_3 = arith.constant 0 : index
    %c0_4 = arith.constant 0 : index
    %3 = vector.load %arg3[%c0_3, %c0_4] : memref<1x128xf32, #tpu.memory_space<vmem>>, vector<1x128xf32>
    %4 = vector.broadcast %3 : vector<1x128xf32> to vector<16x128xf32>
    %5 = arith.addf %2, %4 : vector<16x128xf32>
    %6 = arith.truncf %5 : vector<16x128xf32> to vector<16x128xbf16>
    %c0_5 = arith.constant 0 : index
    %c0_6 = arith.constant 0 : index
    %7 = vector.load %arg4[%c0_5, %c0_6] : memref<16x128xbf16, #tpu.memory_space<vmem>>, vector<16x128xbf16>
    tpu.vector_store %arg4[%c0_5, %c0_6], %6 {strides = array<i32>} : memref<16x128xbf16, #tpu.memory_space<vmem>>, vector<16x128xbf16>,
    return
  }
  func.func @transform_0(%arg0: i32) -> (i32, i32) {
    %c0_i32 = arith.constant 0 : i32
    %c0_i32_0 = arith.constant 0 : i32
    return %arg0, %c0_i32 : i32, i32
  }
  func.func @transform_1(%arg0: i32) -> (i32, i32) {
    %c0_i32 = arith.constant 0 : i32
    %c0_i32_0 = arith.constant 0 : i32
    %c0_i32_1 = arith.constant 0 : i32
    return %c0_i32, %c0_i32_0 : i32, i32
  }
  func.func @transform_2(%arg0: i32) -> (i32, i32) {
    %c0_i32 = arith.constant 0 : i32
    %c0_i32_0 = arith.constant 0 : i32
    %c0_i32_1 = arith.constant 0 : i32
    return %c0_i32, %c0_i32_0 : i32, i32
  }
  func.func @transform_3(%arg0: i32) -> (i32, i32) {
    %c0_i32 = arith.constant 0 : i32
    %c0_i32_0 = arith.constant 0 : i32
    return %arg0, %c0_i32 : i32, i32
  }
}

</mosaic_0001>

<bundles_post_ra>
// kernel: tpu_custom_call.1
= control target key start
LH: loop header
LB: loop body
LE: loop exit
PB: predicated region body
PF: predicated region fallthrough
CT: control target
= control target key end

     0   :  { %8 = vsyncpa [#allocation3], 0  ;;  %s294_s0 = inlined_call_operand.hbm [shape: bf16[16,64], index: 0, kind: input, shape index: {}]   ;;  %s295_s1 = inlined_call_operand.hbm [shape: bf16[64,128], index: 1, kind: input, shape index: {}]   ;;  %s296_s2 = inlined_call_operand.vmem [shape: f32[1,128], index: 2, kind: input, shape index: {}]   ;;  %s297_s3 = inlined_call_operand.hbm [shape: bf16[16,128], index: 3, kind: output, shape index: {}]  }
   0x1   :  { %9 = vsyncpa [#allocation6], 0 }
   0x2   :  { %10 = vsyncpa [#allocation4], 0  ;;  %s15_s14 = sshll.u32 %s294_s0, 4  ;;  %s248_s15 = smov [#allocation2]   ;;  %s16_s14 = int_to_ptr.hbm [resolvable:$true] %s15_s14 }
   0x3   :  { %s17_s16 = sshll.u32 %s248_s15, 4  ;;  %s28_s19 = sshll.u32 %s295_s1, 4  ;;  %s18_s16 = int_to_ptr.vmem [resolvable:$true] %s17_s16  ;;  %s29_s19 = int_to_ptr.hbm [resolvable:$true] %s28_s19 }
   0x4   :  { %s249_s20 = smov 64   ;;  %s250_s21 = smov 4  }
   0x5   :  { %23 = dma.hbm_to_vmem [thread:$0]  %s16_s14, 128, %s18_s16, [#allocation3], %s249_s20, %s249_s20, %s250_s21  }
   0x6   :  { %s251_s22 = smov [#allocation5]  }
   0x7   :  { %s30_s23 = sshll.u32 %s251_s22, 4  ;;  %s31_s23 = int_to_ptr.vmem [resolvable:$true] %s30_s23 }
   0x8   :  { %36 = dma.hbm_to_vmem [thread:$0]  %s29_s19, 512, %s31_s23, [#allocation6], %s249_s20, %s249_s20, %s250_s21  }
   0x9   :  { %242 = dma.done.wait [#allocation3], 128  }
   0xa   :  { %243 = vsyncadd [#allocation3], 4294967168 }
   0xb   :  { %244 = dma.done.wait [#allocation6], 512  }
   0xc   :  { %245 = vsyncadd [#allocation6], 4294966784  ;;  %v158_v0 = vld [vmem:[#allocation5 + $0x18] sm:$0xff]  ;;  %v157_v1 = vld [vmem:[#allocation5 + $0x10] sm:$0xff]  ;;  %vm91_vm0 = vcmask 523264   ;;  %s252_s24 = smov [#allocation7]  }
   0xd   :  { %99 = vmatpush.bf16.msra.mxu0 %v158_v0  ;;  %v156_v2 = vld [vmem:[#allocation5 + $0x8] sm:$0xff]  ;;  %v155_v3 = vld [vmem:[#allocation5] sm:$0xff]  ;;  %v154_v4 = vld [vmem:[#allocation2] sm:$0xff]  ;;  %s117_s25 = sshll.u32 %s252_s24, 4  ;;  %s119_s28 = sshll.u32 %s297_s3, 4  ;;  %s118_s25 = int_to_ptr.vmem [resolvable:$true] %s117_s25  ;;  %s120_s28 = int_to_ptr.hbm [resolvable:$true] %s119_s28 }
   0xe   :  { %v169_v6 = vld [vmem:[%s296_s2] ss:$0 sm:$0xff] }
  0x11   :  { %100 = vmatpush.bf16.msra.mxu0 %v157_v1 }
  0x15   :  { %101 = vmatpush.bf16.msra.mxu0 %v156_v2 }
  0x19   :  { %102 = vmatpush.bf16.msra.mxu0 %v155_v3 }
  0x1c   :  { %153 = vmatmul.msk.bf16.vlgmr.msra.gmra.mxu0 %vm91_vm0, %v154_v4 }
  0x99   :  { %v104_v5 = vpop.f32.mrf.mxu0 }
  0x9a   :  { %v105_v8 = vadd.f32 %v169_v6, %v104_v5 }
  0xa1   :  { %v106_v7 = vpop.f32.mrf.mxu0 }
  0xa2   :  { %v107_v9 = vadd.f32 %v169_v6, %v106_v7 }
  0xa4   :  { %v162_v10 = vpack.c.bf16 %v107_v9, %v105_v8 }
  0xa6   :  { %163 = vst [vmem:[#allocation7] sm:$0xff] %v162_v10  }
  0xa7   :  { %125 = dma.vmem_to_hbm [thread:$0]  %s118_s25, 128, %s120_s28, [#allocation4], %s249_s20, %s249_s20, %s250_s21  }
  0xa8   :  { %246 = dma.done.wait [#allocation4], 128  }
  0xa9   :  { %247 = vsyncadd [#allocation4], 4294967168 }
  0xaa   :  { %130 = vsyncpa [#allocation3], 1 }
  0xab   :  { %131 = vsyncpa [#allocation6], 1 }
  0xac   :  { %132 = vsyncpa [#allocation4], 1 }

</bundles_post_ra>
